<compile_context>
chip_gen: v6e
topology: v6e:2x2x1
jax: 0.10.0
libtpu: 0.0.40
codegen_flags: <defaults>
</compile_context>

<pallas_src>
import functools

import jax
import jax.numpy as jnp
from jax.experimental import pallas as pl
from jax.experimental.pallas import tpu as pltpu


def _layernorm_kernel(x_ref, a_ref, b_ref, o_ref, *, eps, features, approx_recip):
    # x_ref: (row_tile, F), a_ref/b_ref: (1, F), o_ref: (row_tile, F)
    x = x_ref[...].astype(jnp.float32)
    mean = jnp.mean(x, axis=-1, keepdims=True)
    diff = x - mean                      # x is dead after this line
    # torch.std is unbiased by default -> divide by (N - 1); fold into a
    # compile-time constant multiply.
    var = jnp.sum(diff * diff, axis=-1, keepdims=True) * jnp.float32(
        1.0 / (features - 1)
    )
    std = jnp.sqrt(var)
    # One reciprocal per row (shape (row_tile, 1)), reused via broadcast
    # multiply over the (row_tile, F) tile.  approx=True routes to the EUP
    # slot; exact by default to hold 1e-5 tolerance.
    inv = pl.reciprocal(std + jnp.float32(eps), approx=approx_recip)
    # a/b come from constant-index (1, F) blocks; they stay resident in VMEM
    # across grid steps (same block index every step -> no re-DMA).
    a = a_ref[...].astype(jnp.float32)
    b = b_ref[...].astype(jnp.float32)
    o_ref[...] = (a * (diff * inv) + b).astype(o_ref.dtype)


def _vmem_params():
    """(tile_budget_bytes, vmem_limit_bytes), generation-aware with safe fallback."""
    cap = None
    try:
        info = pltpu.get_tpu_info()
        cap = int(getattr(info, "vmem_capacity_bytes", 0)) or None
    except Exception:  # interpret mode / older runtimes
        cap = None
    if cap is None:
        cap = 64 << 20  # assume v7x-sized VMEM: conservative and safe everywhere
    limit = max(32 << 20, cap - (16 << 20))       # always leave >=16 MiB headroom
    budget = max(16 << 20, (cap - (16 << 20)) // 2)
    return budget, limit


def _choose_row_tile(rows, features, itemsize, vmem_budget_bytes):
    """Pick the row tile: big enough to amortize per-step overhead, small enough
    to fit the VMEM budget and to keep >=4 grid steps when rows permit."""
    # Sublane pack width: 8 for f32, 16 for bf16, 32 for 8-bit types.
    sub = max(8, 32 // max(1, itemsize))

    if rows <= sub:
        # Block equals the full array dim along rows (satisfies the (8,128) rule).
        return rows

    # Per row of the tile we hold in VMEM:
    #   - double-buffered input block : 2 * F * itemsize
    #   - double-buffered output block: 2 * F * itemsize
    #   - f32 in-kernel intermediates : ~2 live (row_tile, F) f32 temps
    per_row_bytes = features * (4 * itemsize + 8)
    tile = max(sub, vmem_budget_bytes // per_row_bytes)

    # Sanity cap (well above the few-MiB-per-step bandwidth target).
    tile = min(tile, 16384)

    # Never exceed the rounded-down row count (boundary block handles the tail).
    tile = min(tile, (rows // sub) * sub)

    # Grid-step floor: keep num_tiles >= 4 when rows permit so the parallel
    # axis splits across both v7x TensorCores and the pipeline can overlap.
    floor_cap = ((rows // 4) // sub) * sub
    if floor_cap >= sub:
        tile = min(tile, floor_cap)

    # Round down to the sublane multiple, never below one pack.
    tile = max(sub, (tile // sub) * sub)
    return tile


def layernorm(
    x,
    a_2,
    b_2,
    eps=1e-6,
    row_tile=None,
    vmem_budget_bytes=None,
    approx_recip=False,
):
    """x: (..., F). a_2, b_2: (F,). Returns same shape/dtype as x."""
    orig_shape = x.shape
    features = orig_shape[-1]
    assert features >= 2, "unbiased std needs at least 2 elements (torch: N-1)"

    x2d = x.reshape(-1, features)
    rows = x2d.shape[0]
    itemsize = jnp.dtype(x.dtype).itemsize

    auto_budget, vmem_limit = _vmem_params()
    if vmem_budget_bytes is None:
        vmem_budget_bytes = auto_budget
    if row_tile is None:
        row_tile = _choose_row_tile(rows, features, itemsize, vmem_budget_bytes)

    # No wrapper-side padding: the grid is cdiv on the unpadded array and Pallas
    # masks the boundary block's stores.  Rows are independent, so undefined
    # rows in the tail of the boundary input block only feed masked outputs.
    num_tiles = pl.cdiv(rows, row_tile)

    a2d = a_2.reshape(1, features)
    b2d = b_2.reshape(1, features)

    kernel = functools.partial(
        _layernorm_kernel, eps=eps, features=features, approx_recip=approx_recip
    )

    param_itemsize = jnp.dtype(a_2.dtype).itemsize
    cost = pl.CostEstimate(
        flops=8 * rows * features,
        transcendentals=2 * rows,  # sqrt + reciprocal per row
        bytes_accessed=2 * rows * features * itemsize + 2 * features * param_itemsize,
    )

    out2d = pl.pallas_call(
        kernel,
        out_shape=jax.ShapeDtypeStruct((rows, features), x.dtype),
        grid_spec=pltpu.PrefetchScalarGridSpec(
            num_scalar_prefetch=0,
            grid=(num_tiles,),
            in_specs=[
                # NOTE(v5e sweep knob): pipeline_mode=pl.Buffered(3) here if an
                # xprof trace ever shows exposed input-DMA gaps.
                pl.BlockSpec((row_tile, features), lambda i: (i, 0)),
                pl.BlockSpec((1, features), lambda i: (0, 0)),
                pl.BlockSpec((1, features), lambda i: (0, 0)),
            ],
            out_specs=pl.BlockSpec((row_tile, features), lambda i: (i, 0)),
        ),
        compiler_params=pltpu.CompilerParams(
            dimension_semantics=("parallel",),   # megacore split on v7x
            vmem_limit_bytes=vmem_limit,         # capacity - 16 MiB headroom
        ),
        cost_estimate=cost,
    )(x2d, a2d, b2d)

    return out2d.reshape(orig_shape)


def layernorm_reference(x, a_2, b_2, eps=1e-6):
    # Pure-JAX reference matching the module's semantics (unbiased std, eps on std).
    xf = x.astype(jnp.float32)
    mean = jnp.mean(xf, axis=-1, keepdims=True)
    var = jnp.sum((xf - mean) ** 2, axis=-1, keepdims=True) / (x.shape[-1] - 1)
    std = jnp.sqrt(var)
    return (a_2 * (xf - mean) / (std + eps) + b_2).astype(x.dtype)


if __name__ == "__main__":
    eps = 1e-6
    key = jax.random.PRNGKey(0)

    # Lane-dense small case: batch=2, seq=8, features=128 (multiple of 128).
    batch, seq, features = 2, 8, 128
    k1, k2 = jax.random.split(key)
    x = jax.random.normal(k1, (batch, seq, features), dtype=jnp.float32)

    # Parameter init matching nn.Parameter(torch.ones/zeros(features)).
    a_2 = jnp.ones((features,), dtype=jnp.float32)
    b_2 = jnp.zeros((features,), dtype=jnp.float32)

    out = layernorm(x, a_2, b_2, eps=eps)
    out = jax.block_until_ready(out)
    ref = layernorm_reference(x, a_2, b_2, eps=eps)
    assert out.shape == x.shape and out.dtype == x.dtype
    assert jnp.allclose(out, ref, atol=1e-5, rtol=1e-5), "mismatch vs reference"

    # Ragged row count (exercises the masked boundary-block path, no jnp.pad).
    x2 = jax.random.normal(k2, (3, 5, features), dtype=jnp.float32)
    out2 = jax.block_until_ready(layernorm(x2, a_2, b_2, eps=eps))
    ref2 = layernorm_reference(x2, a_2, b_2, eps=eps)
    assert jnp.allclose(out2, ref2, atol=1e-5, rtol=1e-5), "mismatch (ragged rows)"

    print("KERNEL_OK")
</pallas_src>

<mosaic_0001>
module attributes {stable_mosaic.version = 11 : i64} {
  func.func @_layernorm_kernel(%arg0: i32, %arg1: memref<16x128xf32, #tpu.memory_space<vmem>>, %arg2: memref<1x128xf32, #tpu.memory_space<vmem>>, %arg3: memref<1x128xf32, #tpu.memory_space<vmem>>, %arg4: memref<16x128xf32, #tpu.memory_space<vmem>>) attributes {dimension_semantics = [#tpu.dimension_semantics<parallel>], iteration_bounds = array<i64: 1>, scalar_prefetch = 0 : i64, scratch_operands = 0 : i64, tpu.core_type = #tpu.core_type<tc>, window_params = [{transform_indices = @transform_0, window_bounds = array<i64: 16, 128>}, {pipeline_mode = #tpu.pipeline_mode<synchronous>, transform_indices = @transform_1, window_bounds = array<i64: 1, 128>}, {pipeline_mode = #tpu.pipeline_mode<synchronous>, transform_indices = @transform_2, window_bounds = array<i64: 1, 128>}, {transform_indices = @transform_3, window_bounds = array<i64: 16, 128>}]} {
    %c0 = arith.constant 0 : index
    %c0_0 = arith.constant 0 : index
    %0 = vector.load %arg1[%c0, %c0_0] : memref<16x128xf32, #tpu.memory_space<vmem>>, vector<16x128xf32>
    %cst = arith.constant dense<0.000000e+00> : vector<16xf32>
    %1 = vector.multi_reduction <add>, %0, %cst [1] : vector<16x128xf32> to vector<16xf32>
    %2 = vector.shape_cast %1 : vector<16xf32> to vector<16x1xf32>
    %cst_1 = arith.constant 1.280000e+02 : f32
    %3 = vector.broadcast %cst_1 : f32 to vector<16x1xf32>
    %4 = arith.divf %2, %3 : vector<16x1xf32>
    %5 = vector.broadcast %4 : vector<16x1xf32> to vector<16x128xf32>
    %6 = arith.subf %0, %5 : vector<16x128xf32>
    %7 = arith.mulf %6, %6 : vector<16x128xf32>
    %cst_2 = arith.constant dense<0.000000e+00> : vector<16xf32>
    %8 = vector.multi_reduction <add>, %7, %cst_2 [1] : vector<16x128xf32> to vector<16xf32>
    %9 = vector.shape_cast %8 : vector<16xf32> to vector<16x1xf32>
    %cst_3 = arith.constant 0.00787401571 : f32
    %10 = vector.broadcast %cst_3 : f32 to vector<16x1xf32>
    %11 = arith.mulf %9, %10 : vector<16x1xf32>
    %12 = math.sqrt %11 : vector<16x1xf32>
    %cst_4 = arith.constant 9.99999997E-7 : f32
    %13 = vector.broadcast %cst_4 : f32 to vector<16x1xf32>
    %14 = arith.addf %12, %13 : vector<16x1xf32>
    %15 = tpu.reciprocal %14 : vector<16x1xf32> -> vector<16x1xf32>
    %c0_5 = arith.constant 0 : index
    %c0_6 = arith.constant 0 : index
    %16 = vector.load %arg2[%c0_5, %c0_6] : memref<1x128xf32, #tpu.memory_space<vmem>>, vector<1x128xf32>
    %c0_7 = arith.constant 0 : index
    %c0_8 = arith.constant 0 : index
    %17 = vector.load %arg3[%c0_7, %c0_8] : memref<1x128xf32, #tpu.memory_space<vmem>>, vector<1x128xf32>
    %18 = vector.broadcast %15 : vector<16x1xf32> to vector<16x128xf32>
    %19 = arith.mulf %6, %18 : vector<16x128xf32>
    %20 = vector.broadcast %16 : vector<1x128xf32> to vector<16x128xf32>
    %21 = arith.mulf %20, %19 : vector<16x128xf32>
    %22 = vector.broadcast %17 : vector<1x128xf32> to vector<16x128xf32>
    %23 = arith.addf %21, %22 : vector<16x128xf32>
    %c0_9 = arith.constant 0 : index
    %c0_10 = arith.constant 0 : index
    %24 = vector.load %arg4[%c0_9, %c0_10] : memref<16x128xf32, #tpu.memory_space<vmem>>, vector<16x128xf32>
    tpu.vector_store %arg4[%c0_9, %c0_10], %23 {strides = array<i32>} : memref<16x128xf32, #tpu.memory_space<vmem>>, vector<16x128xf32>,
    return
  }
  func.func @transform_0(%arg0: i32) -> (i32, i32) {
    %c0_i32 = arith.constant 0 : i32
    %c0_i32_0 = arith.constant 0 : i32
    return %arg0, %c0_i32 : i32, i32
  }
  func.func @transform_1(%arg0: i32) -> (i32, i32) {
    %c0_i32 = arith.constant 0 : i32
    %c0_i32_0 = arith.constant 0 : i32
    %c0_i32_1 = arith.constant 0 : i32
    return %c0_i32, %c0_i32_0 : i32, i32
  }
  func.func @transform_2(%arg0: i32) -> (i32, i32) {
    %c0_i32 = arith.constant 0 : i32
    %c0_i32_0 = arith.constant 0 : i32
    %c0_i32_1 = arith.constant 0 : i32
    return %c0_i32, %c0_i32_0 : i32, i32
  }
  func.func @transform_3(%arg0: i32) -> (i32, i32) {
    %c0_i32 = arith.constant 0 : i32
    %c0_i32_0 = arith.constant 0 : i32
    return %arg0, %c0_i32 : i32, i32
  }
}

</mosaic_0001>

<bundles_post_ra>
// kernel: tpu_custom_call.1
= control target key start
LH: loop header
LB: loop body
LE: loop exit
PB: predicated region body
PF: predicated region fallthrough
CT: control target
= control target key end

     0   :  { %8 = vsyncpa [#allocation3], 0  ;;  %s205_s0 = inlined_call_operand.hbm [shape: f32[16,128], index: 0, kind: input, shape index: {}]   ;;  %s206_s1 = inlined_call_operand.vmem [shape: f32[1,128], index: 1, kind: input, shape index: {}]   ;;  %s207_s2 = inlined_call_operand.vmem [shape: f32[1,128], index: 2, kind: input, shape index: {}]   ;;  %s208_s3 = inlined_call_operand.hbm [shape: f32[16,128], index: 3, kind: output, shape index: {}]  }
   0x1   :  { %9 = vsyncpa [#allocation4], 0  ;;  %s163_s12 = smov [#allocation2]  }
   0x2   :  { %s15_s13 = sshll.u32 %s163_s12, 4  ;;  %s16_s13 = int_to_ptr.vmem [resolvable:$true] %s15_s13 }
   0x3   :  { %s127_s14 = scalar_lea.vmem %s16_s13, 256  ;;  %p132_p1 = scmp.lt.s32.totalorder %s16_s13, %s16_s13 }
   0x4   :  { %p128_p0 = scmp.ne.s32.totalorder %s16_s13, %s127_s14  ;;  %p133_p2 = scmp.lt.s32.totalorder %s127_s14, %s127_s14 }
   0x6   :  { %p134_p3 = por %p133_p2, %p132_p1 }
   0x8   :  { %p135_p4 = pnand %p134_p3, %p128_p0 }
   0xa   :  { %138 = shalt.err (!%p135_p4)
}
   0xb   :  { %s164_s15 = smov 128   ;;  %s165_s16 = smov 8  }
   0xc   :  { %21 = dma.hbm_to_vmem [thread:$0]  %s205_s0, 256, %s16_s13, [#allocation3], %s164_s15, %s164_s15, %s165_s16  }
   0xd   :  { %159 = dma.done.wait [#allocation3], 256  }
   0xe   :  { %160 = vsyncadd [#allocation3], 4294967040  ;;  %v29_v0 = vld [vmem:[#allocation2] sm:$0xff]  ;;  %v30_v1 = vld [vmem:[#allocation2 + $0x8] sm:$0xff]  ;;  %s166_s22 = smov [#allocation5]  }
   0xf   :  { %31 = vadd.xlane.f32.xlu0 %v29_v0  ;;  %v105_v27 = vld [vmem:[%s206_s1] ss:$0 sm:$0xff]  ;;  %s93_s23 = sshll.u32 %s166_s22, 4  ;;  %s94_s23 = int_to_ptr.vmem [resolvable:$true] %s93_s23 }
  0x10   :  { %v106_v29 = vld [vmem:[%s207_s2] ss:$0 sm:$0xff]  ;;  %s139_s24 = scalar_lea.vmem %s94_s23, 256  ;;  %p144_p6 = scmp.lt.s32.totalorder %s94_s23, %s94_s23 }
  0x11   :  { %p140_p5 = scmp.ne.s32.totalorder %s94_s23, %s139_s24  ;;  %p145_p7 = scmp.lt.s32.totalorder %s139_s24, %s139_s24 }
  0x13   :  { %33 = vadd.xlane.f32.xlu0 %v30_v1  ;;  %p146_p8 = por %p145_p7, %p144_p6 }
  0x15   :  { %p147_p9 = pnand %p146_p8, %p140_p5 }
  0x98   :  { %v32_v2 = vpop.xlane.xlu0 %31 }
  0x99   :  { %v36_v3 = vmul.f32 0.0078125, %v32_v2 }
  0x9b   :  { %v38_v4 = vsub.f32 %v29_v0, %v36_v3 }
  0x9c   :  { %v34_v5 = vpop.xlane.xlu0 %33 }
  0x9d   :  { %v37_v6 = vmul.f32 0.0078125, %v34_v5  ;;  %v40_v7 = vmul.f32 %v38_v4, %v38_v4 }
  0x9f   :  { %v39_v8 = vsub.f32 %v30_v1, %v37_v6  ;;  %42 = vadd.xlane.f32.xlu1 %v40_v7 }
  0xa1   :  { %v41_v9 = vmul.f32 %v39_v8, %v39_v8 }
  0xa3   :  { %44 = vadd.xlane.f32.xlu1 %v41_v9 }
 0x128   :  { %v43_v10 = vpop.xlane.xlu1 %42 }
 0x129   :  { %v46_v11 = vmul.f32 0.007874016, %v43_v10 }
 0x12b   :  { %111 = vrsqrt.f32 %v46_v11  ;;  %vm50_vm0 = vcmp.eq.f32.partialorder %v46_v11, inf  ;;  %v53_v16 = vand.u32 2147483648, %v46_v11  ;;  %vm52_vm1 = vcmp.eq.f32.partialorder %v46_v11, 0.0 }
 0x12c   :  { %v45_v12 = vpop.xlane.xlu1 %44 }
 0x12d   :  { %v47_v13 = vmul.f32 0.007874016, %v45_v12 }
 0x12f   :  { %113 = vrsqrt.f32 %v47_v13  ;;  %vm57_vm2 = vcmp.eq.f32.partialorder %v47_v13, inf  ;;  %v60_v22 = vand.u32 2147483648, %v47_v13  ;;  %vm59_vm3 = vcmp.eq.f32.partialorder %v47_v13, 0.0 }
 0x138   :  { %v112_v14 = vpop.eup %111 }
 0x139   :  { %v49_v15 = vmul.f32 %v112_v14, %v46_v11 }
 0x13b   :  { %v51_v17 = vsel %vm50_vm0, %v46_v11, %v49_v15 }
 0x13c   :  { %v114_v18 = vpop.eup %113  ;;  %v54_v19 = vsel %vm52_vm1, %v53_v16, %v51_v17 }
 0x13d   :  { %v62_v20 = vadd.f32 1e-06, %v54_v19  ;;  %v56_v21 = vmul.f32 %v114_v18, %v47_v13 }
 0x13f   :  { %115 = vrcp.f32 %v62_v20  ;;  %v58_v23 = vsel %vm57_vm2, %v47_v13, %v56_v21 }
 0x140   :  { %v61_v24 = vsel %vm59_vm3, %v60_v22, %v58_v23 }
 0x141   :  { %v63_v25 = vadd.f32 1e-06, %v61_v24 }
 0x143   :  { %117 = vrcp.f32 %v63_v25 }
 0x14c   :  { %v116_v26 = vpop.eup %115 }
 0x14d   :  { %v68_v28 = vmul.f32 %v116_v26, %v38_v4 }
 0x14f   :  { %v76_v30 = vmul.f32 %v105_v27, %v68_v28 }
 0x150   :  { %v118_v31 = vpop.eup %117 }
 0x151   :  { %v69_v32 = vmul.f32 %v118_v31, %v39_v8  ;;  %v84_v33 = vadd.f32 %v106_v29, %v76_v30 }
 0x153   :  { %v77_v34 = vmul.f32 %v105_v27, %v69_v32  ;;  %86 = vst [vmem:[#allocation5] sm:$0xff] %v84_v33 }
 0x155   :  { %v85_v35 = vadd.f32 %v106_v29, %v77_v34 }
 0x157   :  { %87 = vst [vmem:[#allocation5 + $0x8] sm:$0xff] %v85_v35 }
 0x158   :  { %150 = shalt.err (!%p147_p9)
}
 0x159   :  { %99 = dma.vmem_to_hbm [thread:$0]  %s94_s23, 256, %s208_s3, [#allocation4], %s164_s15, %s164_s15, %s165_s16  }
 0x15a   :  { %161 = dma.done.wait [#allocation4], 256  }
 0x15b   :  { %162 = vsyncadd [#allocation4], 4294967040 }
 0x15c   :  { %103 = vsyncpa [#allocation3], 1 }
 0x15d   :  { %104 = vsyncpa [#allocation4], 1 }

</bundles_post_ra>
